<compile_context>
chip_gen: v5e
topology: v5e:2x2
jax: 0.10.0
libtpu: 0.0.40
codegen_flags: <defaults>
</compile_context>

<pallas_src>
import numpy as np
import jax
import jax.numpy as jnp
from jax import lax
from jax.experimental import pallas as pl
from jax.experimental.pallas import tpu as pltpu

BLOCK_SIZE = 20
HEIGHT = 400
WIDTH = 400
GRID_HEIGHT = HEIGHT // BLOCK_SIZE   # 20
GRID_WIDTH = WIDTH // BLOCK_SIZE     # 20
ACTION_DIM = 4

_ROWS_PER_ELEM = 24                  # 22 padded image rows + 2 zero alignment rows
_BT_CAP = 16                         # batch-tile cap -> M = 16*24 = 384 MXU rows

# conv2's +/-2 row rolls read up to 2 rows past row 19 of every element (and
# wrap into the previous element / end of tile).  Correctness relies on rows
# 20.._ROWS_PER_ELEM-1 of every element being zeroed by the row mask so those
# reads return the conv "SAME" zero padding.  Keep >= 2 trailing zero rows.
assert _ROWS_PER_ELEM >= 22 and _ROWS_PER_ELEM % 8 == 0

_HAS_BUFFERED = hasattr(pl, "Buffered")


# --------------------------------------------------------------------------
# pltpu.roll convention probe (guarantees jnp.roll semantics for our shifts).
# Runs once on the same default backend as the main kernel and is cached.
# --------------------------------------------------------------------------
_ROLL_SIGN = []


def _probe_roll_kernel(x_ref, o_ref):
    o_ref[...] = pltpu.roll(x_ref[...], 1, axis=1)


def _ensure_roll_sign():
    if _ROLL_SIGN:
        return
    x = jnp.arange(8 * 128, dtype=jnp.float32).reshape(8, 128)
    y = pl.pallas_call(
        _probe_roll_kernel,
        out_shape=jax.ShapeDtypeStruct((8, 128), jnp.float32))(x)
    same = bool(jnp.array_equal(y, jnp.roll(x, 1, axis=1)))
    _ROLL_SIGN.append(1 if same else -1)


def _roll(v, shift, axis):
    """jnp.roll-semantics roll (result[i] = v[i - shift]) via pltpu.roll."""
    sign = _ROLL_SIGN[0] if _ROLL_SIGN else 1
    n = v.shape[axis]
    s = (sign * shift) % n
    if s == 0:
        return v
    return pltpu.roll(v, s, axis=axis)


# --------------------------------------------------------------------------
# fused kernel
# --------------------------------------------------------------------------
def _dqn2_kernel(x_ref, mask_ref, sel_ref,
                 w1e_ref, w1o_ref, b1v_ref,
                 w2e_ref, w2o_ref, b2v_ref,
                 wf1_ref, bf1_ref, wf2_ref, bf2_ref, o_ref):
    """Fused conv1+pool1+conv2+pool2+fc1+fc2 for one batch tile.

    x_ref:   (Bt*24, 66)  f32  padded images, lanes = padded_col*3 + cin
    mask_ref:(Bt*24, 1)   f32  1.0 for rows < 20 inside each element, else 0.0
    sel_ref: (5, Bt, Bt*24) bf16 row selectors for the 5 pooled2 spatial rows
    w1e/w1o: (3, 66, 320) bf16 conv1 even/odd-column banded weights (per dy)
    w2e/w2o: (3, 320, 320) bf16 conv2 even/odd-column banded weights (per dy)
    wf1_ref: (5, 320, 128) bf16 fc1 folded onto the compact pooled2 layout
    wf2_ref: (128, 128)    bf16 fc2 zero-padded to 128 output lanes
    o_ref:   (1, Bt, 128)  f32
    """
    f32 = jnp.float32
    bf16 = jnp.bfloat16

    x = x_ref[...]                                            # (M, 66) f32
    x0 = x.astype(bf16)
    x1 = _roll(x, -1, 0).astype(bf16)
    x2 = _roll(x, -2, 0).astype(bf16)

    def dot3(a0, a1, a2, w_ref):
        r = jnp.dot(a0, w_ref[0], preferred_element_type=f32)
        r = r + jnp.dot(a1, w_ref[1], preferred_element_type=f32)
        r = r + jnp.dot(a2, w_ref[2], preferred_element_type=f32)
        return r

    # conv1 (row-banded, even/odd output columns) + pool1 fused:
    # column max = elementwise max of the even/odd results -> compact 320 lanes
    # (lane = pooled1_col*32 + cout).
    c1e = dot3(x0, x1, x2, w1e_ref)                           # (M, 320)
    c1o = dot3(x0, x1, x2, w1o_ref)
    c1 = jnp.maximum(c1e, c1o)                                # pool1 column max
    c1 = jnp.maximum(c1 + b1v_ref[...], 0.0)                  # bias + relu
    p1 = jnp.maximum(c1, _roll(c1, -1, 0))                    # pool1 row max
    p1 = p1 * mask_ref[...]                                   # zero rows >= 20

    # conv2 (row-banded on the stride-2 pooled rows, even/odd output columns).
    # Valid pooled1 rows sit at physical rows 2*y1; row tap dy reads row
    # 2*y2 + 2*dy - 2, realised by rolling the INPUT by +/-2 rows (rolls
    # commute with the row-wise matmul).  Masked rows 20..23 provide the pads.
    p1m = _roll(p1, 2, 0)
    p1p = _roll(p1, -2, 0)
    p1b = p1.astype(bf16)
    p1mb = p1m.astype(bf16)
    p1pb = p1p.astype(bf16)
    c2e = dot3(p1mb, p1b, p1pb, w2e_ref)                      # (M, 320)
    c2o = dot3(p1mb, p1b, p1pb, w2o_ref)
    c2 = jnp.maximum(c2e, c2o)                                # pool2 column max
    c2 = jnp.maximum(c2 + b2v_ref[...], 0.0)                  # bias + relu
    p2 = jnp.maximum(c2, _roll(c2, -2, 0))                    # pool2 row max
    p2b = p2.astype(bf16)

    # fc head: gather the 5 valid pooled2 rows per element (physical rows
    # 0,4,8,12,16) with selector matmuls and contract against the folded fc1
    # weights, then fc2 into a lane-dense 128-wide output.
    acc = jnp.zeros(o_ref.shape[1:], f32)                     # (Bt, 128)
    for k in range(5):
        rows_k = jnp.dot(sel_ref[k], p2b, preferred_element_type=f32)  # (Bt,320)
        acc = acc + jnp.dot(rows_k.astype(bf16), wf1_ref[k],
                            preferred_element_type=f32)
    h = jnp.maximum(acc + bf1_ref[...], 0.0)
    o_ref[0] = (jnp.dot(h.astype(bf16), wf2_ref[...],
                        preferred_element_type=f32) + bf2_ref[...])


# --------------------------------------------------------------------------
# host-side parameter folding (numpy, runs once)
# --------------------------------------------------------------------------
def prepare_params(p):
    w1 = np.asarray(p["w1"], np.float32)    # (32, 3, 3, 3)   OIHW
    b1 = np.asarray(p["b1"], np.float32)
    w2 = np.asarray(p["w2"], np.float32)    # (64, 32, 3, 3)
    b2 = np.asarray(p["b2"], np.float32)
    wf1 = np.asarray(p["wf1"], np.float32)  # (128, 1600)  CHW flatten
    bf1 = np.asarray(p["bf1"], np.float32)
    wf2 = np.asarray(p["wf2"], np.float32)  # (A, 128)
    bf2 = np.asarray(p["bf2"], np.float32)
    action_dim = wf2.shape[0]

    # conv1 banded weights, split into even/odd OUTPUT columns so pool1's
    # column max needs no lane movement.  Input lane = padded_col*3 + cin,
    # output lane = pooled1_col*32 + cout (compact, 320 lanes).
    w1t = w1.transpose(2, 3, 1, 0)                      # (dy, dx, cin, cout)
    w1eo = np.zeros((2, 3, 66, 320), np.float32)
    for eo in range(2):
        for dy in range(3):
            for dx in range(3):
                for pc in range(10):
                    xo = 2 * pc + eo                    # conv1 output column
                    xi = xo + dx                        # padded input column
                    w1eo[eo, dy, xi * 3:(xi + 1) * 3,
                         pc * 32:(pc + 1) * 32] = w1t[dy, dx]
    b1v = np.tile(b1, 10).reshape(1, 320)

    # conv2 banded weights on the compact pooled1 layout, even/odd output
    # columns.  Input lane = pooled1_col*32 + cin (320, no dead lanes),
    # output lane = pooled2_col*64 + cout (compact, 320 lanes).
    w2t = w2.transpose(2, 3, 1, 0)                      # (dy, dx, 32, 64)
    w2eo = np.zeros((2, 3, 320, 320), np.float32)
    for eo in range(2):
        for dy in range(3):
            for dx in range(3):
                for qc in range(5):
                    xo = 2 * qc + eo                    # conv2 output column
                    xi = xo + dx - 1                    # pooled1 input column
                    if 0 <= xi < 10:
                        w2eo[eo, dy, xi * 32:(xi + 1) * 32,
                             qc * 64:(qc + 1) * 64] = w2t[dy, dx]
    b2v = np.tile(b2, 5).reshape(1, 320)

    # fc1 folded onto the compact pooled2 lane layout (lane = w*64 + c),
    # one (320, 128) slab per pooled2 row h.
    wf1t = wf1.reshape(128, 64, 5, 5)                   # (j, c, h, w)
    wf1k = np.zeros((5, 320, 128), np.float32)
    for h in range(5):
        for w in range(5):
            wf1k[h, w * 64:(w + 1) * 64, :] = wf1t[:, :, h, w].T
    bf1v = bf1.reshape(1, 128)

    wf2p = np.zeros((128, 128), np.float32)
    wf2p[:, :action_dim] = wf2.T
    bf2p = np.zeros((1, 128), np.float32)
    bf2p[0, :action_dim] = bf2

    bf16 = jnp.bfloat16
    tensors = (
        jnp.asarray(w1eo[0], bf16), jnp.asarray(w1eo[1], bf16), jnp.asarray(b1v),
        jnp.asarray(w2eo[0], bf16), jnp.asarray(w2eo[1], bf16), jnp.asarray(b2v),
        jnp.asarray(wf1k, bf16), jnp.asarray(bf1v),
        jnp.asarray(wf2p, bf16), jnp.asarray(bf2p),
    )
    return {"tensors": tensors, "action_dim": action_dim}


# --------------------------------------------------------------------------
# batch tiling + cached masks / selectors
# --------------------------------------------------------------------------
def _pick_btile(batch):
    # One tile for small batches (v5e/v6e have a single TensorCore, so extra
    # grid steps are pure serial overhead); tiles of _BT_CAP (M = 384 rows)
    # above that.  On v7x an even tile count keeps both TensorCores busy.
    return batch if batch <= _BT_CAP else _BT_CAP


_MASK_CACHE = {}


def _get_masks(b_tile):
    if b_tile not in _MASK_CACHE:
        n = b_tile * _ROWS_PER_ELEM
        r = np.arange(n)
        rowmask = ((r % _ROWS_PER_ELEM) < 20).astype(np.float32).reshape(n, 1)
        sel = np.zeros((5, b_tile, n), np.float32)
        for k in range(5):
            for b in range(b_tile):
                sel[k, b, b * _ROWS_PER_ELEM + 4 * k] = 1.0
        _MASK_CACHE[b_tile] = (jnp.asarray(rowmask),
                               jnp.asarray(sel, jnp.bfloat16))
    return _MASK_CACHE[b_tile]


# --------------------------------------------------------------------------
# forward pass
# --------------------------------------------------------------------------
@jax.jit
def _forward_impl(x_nchw, rowmask, selmat,
                  w1e, w1o, b1v, w2e, w2o, b2v, wf1k, bf1v, wf2p, bf2p):
    batch = x_nchw.shape[0]
    b_tile = selmat.shape[1]
    n_rows = b_tile * _ROWS_PER_ELEM
    n_tiles = batch // b_tile

    # NCHW -> (B*24, 66): rows = padded image rows (+2 zero alignment rows),
    # lanes = padded_col*3 + channel.
    x = jnp.transpose(x_nchw, (0, 2, 3, 1)).astype(jnp.float32)   # (B,20,20,3)
    x = jnp.pad(x, ((0, 0), (1, 1), (1, 1), (0, 0)))              # (B,22,22,3)
    x = x.reshape(batch, 22, 66)
    x = jnp.pad(x, ((0, 0), (0, 2), (0, 0)))                      # (B,24,66)
    x = x.reshape(batch * _ROWS_PER_ELEM, 66)

    # Grid-invariant operands (constant index maps) need no double buffering.
    inv = ({"pipeline_mode": pl.Buffered(1)}
           if (n_tiles > 1 and _HAS_BUFFERED) else {})

    out = pl.pallas_call(
        _dqn2_kernel,
        out_shape=jax.ShapeDtypeStruct((n_tiles, b_tile, 128), jnp.float32),
        grid=(n_tiles,),
        in_specs=[
            pl.BlockSpec((n_rows, 66), lambda i: (i, 0)),
            pl.BlockSpec((n_rows, 1), lambda i: (0, 0), **inv),
            pl.BlockSpec((5, b_tile, n_rows), lambda i: (0, 0, 0), **inv),
            pl.BlockSpec((3, 66, 320), lambda i: (0, 0, 0), **inv),
            pl.BlockSpec((3, 66, 320), lambda i: (0, 0, 0), **inv),
            pl.BlockSpec((1, 320), lambda i: (0, 0), **inv),
            pl.BlockSpec((3, 320, 320), lambda i: (0, 0, 0), **inv),
            pl.BlockSpec((3, 320, 320), lambda i: (0, 0, 0), **inv),
            pl.BlockSpec((1, 320), lambda i: (0, 0), **inv),
            pl.BlockSpec((5, 320, 128), lambda i: (0, 0, 0), **inv),
            pl.BlockSpec((1, 128), lambda i: (0, 0), **inv),
            pl.BlockSpec((128, 128), lambda i: (0, 0), **inv),
            pl.BlockSpec((1, 128), lambda i: (0, 0), **inv),
        ],
        out_specs=pl.BlockSpec((1, b_tile, 128), lambda i: (i, 0, 0)),
        compiler_params=pltpu.CompilerParams(
            dimension_semantics=("parallel",),
            vmem_limit_bytes=32 * 1024 * 1024),
    )(x, rowmask, selmat, w1e, w1o, b1v, w2e, w2o, b2v, wf1k, bf1v, wf2p, bf2p)
    return out.reshape(batch, 128)


def dqn2_forward(x_nchw, prep):
    _ensure_roll_sign()
    batch = x_nchw.shape[0]
    b_tile = _pick_btile(batch)
    pad = (-batch) % b_tile
    if pad:                                   # ragged batch: pad, never Bt=1
        x_nchw = jnp.concatenate(
            [x_nchw, jnp.zeros((pad,) + x_nchw.shape[1:], x_nchw.dtype)], 0)
    rowmask, selmat = _get_masks(b_tile)
    out = _forward_impl(x_nchw, rowmask, selmat, *prep["tensors"])
    return out[:batch, :prep["action_dim"]]


# --------------------------------------------------------------------------
# pure-JAX reference (PyTorch NCHW semantics) + parameter init
# --------------------------------------------------------------------------
def dqn2_reference(x_nchw, p):
    dn = ("NCHW", "OIHW", "NCHW")
    y = lax.conv_general_dilated(x_nchw, p["w1"], (1, 1), "SAME",
                                 dimension_numbers=dn)
    y = jnp.maximum(y + p["b1"].reshape(1, -1, 1, 1), 0.0)
    B, C, H, W = y.shape
    y = y.reshape(B, C, H // 2, 2, W // 2, 2).max(axis=(3, 5))
    y = lax.conv_general_dilated(y, p["w2"], (1, 1), "SAME",
                                 dimension_numbers=dn)
    y = jnp.maximum(y + p["b2"].reshape(1, -1, 1, 1), 0.0)
    B, C, H, W = y.shape
    y = y.reshape(B, C, H // 2, 2, W // 2, 2).max(axis=(3, 5))
    y = y.reshape(B, -1)                                  # (B, 1600) CHW order
    y = jnp.maximum(y @ p["wf1"].T + p["bf1"], 0.0)
    return y @ p["wf2"].T + p["bf2"]


def init_params(key, action_dim=ACTION_DIM):
    ks = jax.random.split(key, 8)

    def u(k, shape, fan_in):
        bound = 1.0 / jnp.sqrt(jnp.float32(fan_in))
        return jax.random.uniform(k, shape, jnp.float32, -bound, bound)

    conv_out = 64 * (GRID_HEIGHT // 4) * (GRID_WIDTH // 4)  # 1600
    return dict(
        w1=u(ks[0], (32, 3, 3, 3), 3 * 9),    b1=u(ks[1], (32,), 3 * 9),
        w2=u(ks[2], (64, 32, 3, 3), 32 * 9),  b2=u(ks[3], (64,), 32 * 9),
        wf1=u(ks[4], (128, conv_out), conv_out), bf1=u(ks[5], (128,), conv_out),
        wf2=u(ks[6], (action_dim, 128), 128),  bf2=u(ks[7], (action_dim,), 128),
    )


if __name__ == "__main__":
    key = jax.random.PRNGKey(0)
    kx, kp = jax.random.split(key)
    x = jax.random.uniform(kx, (2, 3, GRID_HEIGHT, GRID_WIDTH), jnp.float32)
    params = init_params(kp)
    prep = prepare_params(params)

    out = jax.block_until_ready(dqn2_forward(x, prep))
    ref = jax.block_until_ready(dqn2_reference(x, params))

    assert out.shape == (2, ACTION_DIM), out.shape
    # bf16 MXU operands with f32 accumulation: 1e-2 tolerances still hold.
    assert jnp.allclose(out, ref, atol=1e-2, rtol=1e-2), (out, ref)
    print("KERNEL_OK")
</pallas_src>

<mosaic_0001>
module attributes {stable_mosaic.version = 11 : i64} {
  func.func @_probe_roll_kernel(%arg0: memref<8x128xf32, #tpu.memory_space<vmem>>, %arg1: memref<8x128xf32, #tpu.memory_space<vmem>>) attributes {dimension_semantics = [], scalar_prefetch = 0 : i64, scratch_operands = 0 : i64, tpu.core_type = #tpu.core_type<tc>} {
    %c0 = arith.constant 0 : index
    %c0_0 = arith.constant 0 : index
    %0 = vector.load %arg0[%c0, %c0_0] : memref<8x128xf32, #tpu.memory_space<vmem>>, vector<8x128xf32>
    %c1_i32 = arith.constant 1 : i32
    %1 = tpu.dynamic_rotate %0 by %c1_i32 dim 1 : vector<8x128xf32>, i32 -> vector<8x128xf32>
    %c0_1 = arith.constant 0 : index
    %c0_2 = arith.constant 0 : index
    %2 = vector.load %arg1[%c0_1, %c0_2] : memref<8x128xf32, #tpu.memory_space<vmem>>, vector<8x128xf32>
    tpu.vector_store %arg1[%c0_1, %c0_2], %1 {strides = array<i32>} : memref<8x128xf32, #tpu.memory_space<vmem>>, vector<8x128xf32>,
    return
  }
}

</mosaic_0001>

<bundles_post_ra>
// kernel: tpu_custom_call.1
= control target key start
LH: loop header
LB: loop body
LE: loop exit
PB: predicated region body
PF: predicated region fallthrough
CT: control target
= control target key end

     0   :  { %6 = vsyncpa [#allocation3], 0  ;;  %s118_s0 = inlined_call_operand.hbm [shape: f32[8,128], index: 0, kind: input, shape index: {}]   ;;  %s119_s1 = inlined_call_operand.hbm [shape: f32[8,128], index: 1, kind: output, shape index: {}]  }
   0x1   :  { %7 = vsyncpa [#allocation4], 0  ;;  %s13_s8 = sshll.u32 %s118_s0, 4  ;;  %s99_s9 = smov [#allocation2]   ;;  %s14_s8 = int_to_ptr.hbm [resolvable:$true] %s13_s8 }
   0x2   :  { %s15_s10 = sshll.u32 %s99_s9, 4  ;;  %s16_s10 = int_to_ptr.vmem [resolvable:$true] %s15_s10 }
   0x3   :  { %18 = dma.hbm_to_vmem [thread:$0]  %s14_s8, 128, %s16_s10, [#allocation3]  }
   0x4   :  { %95 = dma.done.wait [#allocation3], 128  }
   0x5   :  { %96 = vsyncadd [#allocation3], 4294967168  ;;  %v23_v0 = vld [vmem:[#allocation2] sm:$0xff]  ;;  %s100_s11 = smov 1   ;;  %s101_s12 = smov [#allocation5]  }
   0x6   :  { %24 = vrot.lane.b32.xlu0 %v23_v0, %s100_s11  ;;  %s32_s13 = sshll.u32 %s101_s12, 4  ;;  %s34_s16 = sshll.u32 %s119_s1, 4  ;;  %s33_s13 = int_to_ptr.vmem [resolvable:$true] %s32_s13  ;;  %s35_s16 = int_to_ptr.hbm [resolvable:$true] %s34_s16 }
  0x78   :  { %v25_v1 = vpop.permute.xlu0 %24 }
  0x79   :  { %26 = vst [vmem:[#allocation5] sm:$0xff] %v25_v1 }
  0x7a   :  { %37 = dma.vmem_to_hbm [thread:$0]  %s33_s13, 128, %s35_s16, [#allocation4]  }
  0x7b   :  { %97 = dma.done.wait [#allocation4], 128  }
  0x7c   :  { %98 = vsyncadd [#allocation4], 4294967168 }
  0x7d   :  { %42 = vsyncpa [#allocation3], 1 }
  0x7e   :  { %43 = vsyncpa [#allocation4], 1 }

</bundles_post_ra>
